<compile_context>
chip_gen: v6e
topology: v6e:2x2x1
jax: 0.10.0
libtpu: 0.0.40
codegen_flags: <defaults>
</compile_context>

<pallas_src>
import math
import jax
import jax.numpy as jnp
from jax import lax
from jax.experimental import pallas as pl
from jax.experimental.pallas import tpu as pltpu


_ACT_DTYPE = jnp.bfloat16   # storage dtype for activations / gate streams
_WGT_DTYPE = jnp.bfloat16   # storage dtype for weights


# ---------------------------------------------------------------------------
# VMEM budgets (generation aware: v5e/v6e have 128 MiB physical VMEM, v7x 64).
# ---------------------------------------------------------------------------
def _query_vmem_capacity():
    try:
        info = pltpu.get_tpu_info()
        cap = getattr(info, "vmem_capacity_bytes", None)
        if cap:
            return int(cap)
    except Exception:
        pass
    return 64 * 1024 * 1024  # conservative default (v7x-sized)


_VMEM_CAP = _query_vmem_capacity()
if _VMEM_CAP >= 100 * 1024 * 1024:      # v5e / v6e (128 MiB physical VMEM)
    _VMEM_LIMIT = 64 * 1024 * 1024
    _TILE_BUDGET = 32 * 1024 * 1024
else:                                   # v7x (64 MiB physical per TensorCore)
    _VMEM_LIMIT = 48 * 1024 * 1024
    _TILE_BUDGET = 16 * 1024 * 1024


def _round_up(x, m):
    return (x + m - 1) // m * m


def _pack_gate_cols(w_t, H, Hp):
    """(rows, 4H) with PyTorch gate order (i,f,g,o) -> (rows, 4*Hp).

    Each gate slab is placed at a 128-lane-aligned offset g*Hp; padded hidden
    columns are zero (padded hidden units provably stay 0 through the cell).
    """
    rows = w_t.shape[0]
    w = w_t.reshape(rows, 4, H)
    w = jnp.pad(w, ((0, 0), (0, 0), (0, Hp - H)))
    return w.reshape(rows, 4 * Hp)


# ---------------------------------------------------------------------------
# Pallas kernels
# ---------------------------------------------------------------------------
def _linear1_kernel(x_ref, w_ref, b_ref, o_ref):
    """o = x @ w + b, x block (Tt, Np, K) flattened to (Tt*Np, K)."""
    Tt, Np, K = x_ref.shape
    x2 = x_ref[...].reshape(Tt * Np, K)
    o = jnp.dot(x2, w_ref[...], preferred_element_type=jnp.float32) + b_ref[...]
    o_ref[...] = o.reshape(Tt, Np, -1).astype(o_ref.dtype)


def _linear2_kernel(xa_ref, xb_ref, wa_ref, wb_ref, b_ref, o_ref):
    """o = xa @ wa + xb @ wb + b  (consumes fwd/bwd halves without a concat)."""
    Tt, Np, K = xa_ref.shape
    xa = xa_ref[...].reshape(Tt * Np, K)
    xb = xb_ref[...].reshape(Tt * Np, K)
    o = (jnp.dot(xa, wa_ref[...], preferred_element_type=jnp.float32)
         + jnp.dot(xb, wb_ref[...], preferred_element_type=jnp.float32)
         + b_ref[...])
    o_ref[...] = o.reshape(Tt, Np, -1).astype(o_ref.dtype)


def _make_bilstm_kernel(T_real, Tt, nb, Hp):
    """Fused bidirectional LSTM recurrence over one time block per grid step.

    gf_ref: (Tt, Np, 4Hp) bf16 gate pre-activations, fwd, time block i
    gb_ref: (Tt, Np, 4Hp) bf16 gate pre-activations, bwd, time block nb-1-i
    whh_*:  (Hp, 4Hp)     bf16 hidden->gate weights (gate slabs 128-aligned)
    of_ref: (Tt, Np, Hp)  bf16 fwd hidden states, time block i
    ob_ref: (Tt, Np, Hp)  bf16 bwd hidden states, time block nb-1-i
    hf/cf/hb/cb: (Np, Hp) f32 persistent VMEM state across grid steps.
    """

    def kernel(gf_ref, gb_ref, whh_f_ref, whh_b_ref, of_ref, ob_ref,
               hf, cf, hb, cb):
        i = pl.program_id(0)

        @pl.when(i == 0)
        def _():
            hf[...] = jnp.zeros_like(hf)
            cf[...] = jnp.zeros_like(cf)
            hb[...] = jnp.zeros_like(hb)
            cb[...] = jnp.zeros_like(cb)

        t0_b = (nb - 1 - i) * Tt        # global time offset of the bwd block

        def cell(pre, c):
            i_g = jax.nn.sigmoid(pre[:, 0 * Hp:1 * Hp])
            f_g = jax.nn.sigmoid(pre[:, 1 * Hp:2 * Hp])
            g_g = jnp.tanh(pre[:, 2 * Hp:3 * Hp])
            o_g = jax.nn.sigmoid(pre[:, 3 * Hp:4 * Hp])
            c_new = f_g * c + i_g * g_g
            h_new = o_g * jnp.tanh(c_new)
            return h_new, c_new

        def step(tt, carry):
            hf_v, cf_v, hb_v, cb_v = carry

            # ---- forward direction (global time i*Tt + tt, increasing) ----
            pre_f = (gf_ref[tt].astype(jnp.float32)
                     + jnp.dot(hf_v.astype(jnp.bfloat16), whh_f_ref[...],
                               preferred_element_type=jnp.float32))
            hf_new, cf_new = cell(pre_f, cf_v)
            of_ref[tt] = hf_new.astype(of_ref.dtype)

            # ---- backward direction (global time decreasing) ----
            tb = Tt - 1 - tt
            pre_b = (gb_ref[tb].astype(jnp.float32)
                     + jnp.dot(hb_v.astype(jnp.bfloat16), whh_b_ref[...],
                               preferred_element_type=jnp.float32))
            hb_new, cb_new = cell(pre_b, cb_v)
            ob_ref[tb] = hb_new.astype(ob_ref.dtype)
            # zero-padded tail steps are processed first by the bwd direction;
            # they must not perturb the running state.
            valid = (t0_b + tb) < T_real
            hb_keep = jnp.where(valid, hb_new, hb_v)
            cb_keep = jnp.where(valid, cb_new, cb_v)
            return (hf_new, cf_new, hb_keep, cb_keep)

        carry = (hf[...], cf[...], hb[...], cb[...])
        carry = lax.fori_loop(0, Tt, step, carry, unroll=2)
        hf[...], cf[...], hb[...], cb[...] = carry

    return kernel


# ---------------------------------------------------------------------------
# pallas_call wrappers
# ---------------------------------------------------------------------------
def linear1(x, w, b, Tt, out_dtype):
    T_pad, Np, K = x.shape
    Nout = w.shape[1]
    nb = T_pad // Tt
    return pl.pallas_call(
        _linear1_kernel,
        out_shape=jax.ShapeDtypeStruct((T_pad, Np, Nout), out_dtype),
        grid=(nb,),
        in_specs=[
            pl.BlockSpec((Tt, Np, K), lambda i: (i, 0, 0)),
            pl.BlockSpec((K, Nout), lambda i: (0, 0)),
            pl.BlockSpec((1, Nout), lambda i: (0, 0)),
        ],
        out_specs=pl.BlockSpec((Tt, Np, Nout), lambda i: (i, 0, 0)),
        compiler_params=pltpu.CompilerParams(
            dimension_semantics=("parallel",),
            vmem_limit_bytes=_VMEM_LIMIT),
    )(x, w, b)


def linear2(xa, xb, wa, wb, b, Tt, out_dtype):
    T_pad, Np, K = xa.shape
    Nout = wa.shape[1]
    nb = T_pad // Tt
    return pl.pallas_call(
        _linear2_kernel,
        out_shape=jax.ShapeDtypeStruct((T_pad, Np, Nout), out_dtype),
        grid=(nb,),
        in_specs=[
            pl.BlockSpec((Tt, Np, K), lambda i: (i, 0, 0)),
            pl.BlockSpec((Tt, Np, K), lambda i: (i, 0, 0)),
            pl.BlockSpec((K, Nout), lambda i: (0, 0)),
            pl.BlockSpec((K, Nout), lambda i: (0, 0)),
            pl.BlockSpec((1, Nout), lambda i: (0, 0)),
        ],
        out_specs=pl.BlockSpec((Tt, Np, Nout), lambda i: (i, 0, 0)),
        compiler_params=pltpu.CompilerParams(
            dimension_semantics=("parallel",),
            vmem_limit_bytes=_VMEM_LIMIT),
    )(xa, xb, wa, wb, b)


def bilstm_layer(xg, whh_f, whh_b, T_real, Tt):
    """xg: (T_pad, Np, 8*Hp) gate pre-activations (fwd gates | bwd gates)."""
    T_pad, Np, G8 = xg.shape
    Hp = G8 // 8
    nb = T_pad // Tt
    kernel = _make_bilstm_kernel(T_real, Tt, nb, Hp)
    out_sd = jax.ShapeDtypeStruct((T_pad, Np, Hp), _ACT_DTYPE)
    return pl.pallas_call(
        kernel,
        out_shape=(out_sd, out_sd),
        grid=(nb,),
        in_specs=[
            # fwd gate stream: time block i, feature block 0 (cols [0:4Hp))
            pl.BlockSpec((Tt, Np, 4 * Hp), lambda i: (i, 0, 0)),
            # bwd gate stream: time block nb-1-i, feature block 1 (cols [4Hp:8Hp))
            pl.BlockSpec((Tt, Np, 4 * Hp), lambda i: (nb - 1 - i, 0, 1)),
            pl.BlockSpec((Hp, 4 * Hp), lambda i: (0, 0)),
            pl.BlockSpec((Hp, 4 * Hp), lambda i: (0, 0)),
        ],
        out_specs=(
            pl.BlockSpec((Tt, Np, Hp), lambda i: (i, 0, 0)),
            pl.BlockSpec((Tt, Np, Hp), lambda i: (nb - 1 - i, 0, 0)),
        ),
        scratch_shapes=[pltpu.VMEM((Np, Hp), jnp.float32)] * 4,
        compiler_params=pltpu.CompilerParams(
            dimension_semantics=("arbitrary",),   # carries h/c state across steps
            vmem_limit_bytes=_VMEM_LIMIT),
    )(xg, xg, whh_f, whh_b)


# ---------------------------------------------------------------------------
# Glue (framing / unfold, parameter setup)
# ---------------------------------------------------------------------------
def _unfold(a, kernel_size, stride):
    """[*OT, T] -> [*OT, F, K] with F = ceil(T / stride), zero padded."""
    *shape, length = a.shape
    n_frames = math.ceil(length / stride)
    tgt_length = (n_frames - 1) * stride + kernel_size
    pad = [(0, 0)] * (a.ndim - 1) + [(0, tgt_length - length)]
    a = jnp.pad(a, pad)
    idx = jnp.arange(n_frames)[:, None] * stride + jnp.arange(kernel_size)[None, :]
    return a[..., idx]


class BLSTM:
    def __init__(self, dim, layers=1, max_steps=None, skip=False, key=None):
        assert max_steps is None or max_steps % 4 == 0
        self.dim = dim
        self.layers = layers
        self.max_steps = max_steps
        self.skip = skip

        H = dim
        Hp = _round_up(H, 128)        # lane-aligned hidden width
        self.hp = Hp
        self.din_p = _round_up(dim, 128)

        if key is None:
            key = jax.random.PRNGKey(0)
        scale = 1.0 / math.sqrt(dim)

        self.w_in = []   # layer 0: (Din_p, 8Hp); layer>0: ((Hp,8Hp),(Hp,8Hp)) [bf16]
        self.b_in = []   # (1, 8Hp) per layer (b_ih + b_hh, both directions) [f32]
        self.w_hh = []   # ((Hp,4Hp),(Hp,4Hp)) per layer [bf16]

        for l in range(layers):
            din = dim if l == 0 else 2 * dim
            per_dir = []
            for _d in range(2):
                key, k1, k2, k3, k4 = jax.random.split(key, 5)
                w_ih = jax.random.uniform(k1, (4 * dim, din), jnp.float32, -scale, scale)
                w_hh = jax.random.uniform(k2, (4 * dim, dim), jnp.float32, -scale, scale)
                b_ih = jax.random.uniform(k3, (4 * dim,), jnp.float32, -scale, scale)
                b_hh = jax.random.uniform(k4, (4 * dim,), jnp.float32, -scale, scale)
                per_dir.append((w_ih, w_hh, b_ih + b_hh))

            whh_p = []
            for (_, w_hh, _) in per_dir:
                w = _pack_gate_cols(w_hh.T, H, Hp)                # (H, 4Hp)
                w = jnp.pad(w, ((0, Hp - H), (0, 0)))             # (Hp, 4Hp)
                whh_p.append(w.astype(_WGT_DTYPE))
            self.w_hh.append(tuple(whh_p))

            b_cat = jnp.concatenate(
                [_pack_gate_cols(b[None, :], H, Hp) for (_, _, b) in per_dir], axis=1)
            self.b_in.append(b_cat)                                # (1, 8Hp) f32

            if l == 0:
                w = jnp.concatenate(
                    [_pack_gate_cols(w_ih.T, H, Hp) for (w_ih, _, _) in per_dir], axis=1)
                w = jnp.pad(w, ((0, self.din_p - dim), (0, 0)))    # (Din_p, 8Hp)
                self.w_in.append(w.astype(_WGT_DTYPE))
            else:
                wa, wb = [], []
                for (w_ih, _, _) in per_dir:
                    wt = w_ih.T                                    # (2H, 4H)
                    wa.append(jnp.pad(_pack_gate_cols(wt[:H], H, Hp), ((0, Hp - H), (0, 0))))
                    wb.append(jnp.pad(_pack_gate_cols(wt[H:], H, Hp), ((0, Hp - H), (0, 0))))
                self.w_in.append((jnp.concatenate(wa, axis=1).astype(_WGT_DTYPE),
                                  jnp.concatenate(wb, axis=1).astype(_WGT_DTYPE)))

        # Linear(2*dim, dim), split by direction halves, padded to (Hp, Hp).
        key, k1, k2 = jax.random.split(key, 3)
        lin_scale = 1.0 / math.sqrt(2 * dim)
        w_lin = jax.random.uniform(k1, (dim, 2 * dim), jnp.float32, -lin_scale, lin_scale)
        b_lin = jax.random.uniform(k2, (dim,), jnp.float32, -lin_scale, lin_scale)
        wt = w_lin.T                                               # (2dim, dim)
        self.w_lin_f = jnp.pad(wt[:dim], ((0, Hp - dim), (0, Hp - dim))).astype(_WGT_DTYPE)
        self.w_lin_b = jnp.pad(wt[dim:], ((0, Hp - dim), (0, Hp - dim))).astype(_WGT_DTYPE)
        self.b_lin = jnp.pad(b_lin, (0, Hp - dim))[None, :]        # f32

    def _time_tile(self, Tseq, Np):
        # Approximate double-buffered bf16 activation bytes per time step
        # (gate streams for both directions + hidden-state outputs), with
        # margin; the generation-specific budget keeps v7x under 64 MiB.
        per_t = 48 * Np * self.hp
        return max(1, min(Tseq, _TILE_BUDGET // per_t, 512))

    def __call__(self, x):
        B, C, T = x.shape
        assert C == self.dim
        y = x
        framed = False
        width = stride = nframes = None

        if self.max_steps is not None and T > self.max_steps:
            width = self.max_steps
            stride = width // 2
            frames = _unfold(x, width, stride)                     # (B, C, F, width)
            nframes = frames.shape[2]
            framed = True
            x = jnp.transpose(frames, (0, 2, 1, 3)).reshape(-1, C, width)

        N, _, Tseq = x.shape
        xt = jnp.transpose(x, (2, 0, 1)).astype(_ACT_DTYPE)        # (Tseq, N, C)

        Np = _round_up(N, 16)                                      # bf16 sublane-dense rows
        Tt = self._time_tile(Tseq, Np)
        T_pad = _round_up(Tseq, Tt)
        xt = jnp.pad(xt, ((0, T_pad - Tseq), (0, Np - N), (0, self.din_p - C)))

        of = ob = None
        for l in range(self.layers):
            if l == 0:
                xg = linear1(xt, self.w_in[0], self.b_in[0], Tt, _ACT_DTYPE)
            else:
                wa, wb = self.w_in[l]
                xg = linear2(of, ob, wa, wb, self.b_in[l], Tt, _ACT_DTYPE)
            of, ob = bilstm_layer(xg, self.w_hh[l][0], self.w_hh[l][1], Tseq, Tt)

        out = linear2(of, ob, self.w_lin_f, self.w_lin_b, self.b_lin, Tt, jnp.float32)
        out = out[:Tseq, :N, :self.dim]                            # drop padding
        x = jnp.transpose(out, (1, 2, 0))                          # (N, C, Tseq)

        if framed:
            frames_out = x.reshape(B, nframes, C, width)
            limit = stride // 2
            head = frames_out[:, 0, :, :limit]
            middle = jnp.transpose(frames_out[:, :, :, limit:width - limit],
                                   (0, 2, 1, 3)).reshape(B, C, -1)
            tail = frames_out[:, -1, :, width - limit:]
            x = jnp.concatenate([head, middle, tail], axis=-1)[..., :T]

        if self.skip:
            x = x + y
        return x


# ---------------------------------------------------------------------------
if __name__ == "__main__":
    key = jax.random.PRNGKey(0)
    k_x, k_params = jax.random.split(key)

    B, C, T = 2, 16, 16
    x = jax.random.normal(k_x, (B, C, T), jnp.float32)

    # max_steps=8 < T=16 exercises the overlapped-chunk path; skip connection on.
    model = BLSTM(dim=C, layers=1, max_steps=8, skip=True, key=k_params)

    out = model(x)
    out = jax.block_until_ready(out)
    assert out.shape == (B, C, T), out.shape
    assert jnp.all(jnp.isfinite(out))
    print("KERNEL_OK")
</pallas_src>

<mosaic_0001>
module attributes {stable_mosaic.version = 11 : i64} {
  func.func @_linear1_kernel(%arg0: i32, %arg1: memref<8x16x128xbf16, #tpu.memory_space<vmem>>, %arg2: memref<128x1024xbf16, #tpu.memory_space<vmem>>, %arg3: memref<1x1024xf32, #tpu.memory_space<vmem>>, %arg4: memref<8x16x1024xbf16, #tpu.memory_space<vmem>>) attributes {dimension_semantics = [#tpu.dimension_semantics<parallel>], iteration_bounds = array<i64: 1>, scalar_prefetch = 0 : i64, scratch_operands = 0 : i64, tpu.core_type = #tpu.core_type<tc>, window_params = [{transform_indices = @transform_0, window_bounds = array<i64: 8, 16, 128>}, {pipeline_mode = #tpu.pipeline_mode<synchronous>, transform_indices = @transform_1, window_bounds = array<i64: 128, 1024>}, {pipeline_mode = #tpu.pipeline_mode<synchronous>, transform_indices = @transform_2, window_bounds = array<i64: 1, 1024>}, {transform_indices = @transform_3, window_bounds = array<i64: 8, 16, 1024>}]} {
    %c0 = arith.constant 0 : index
    %c0_0 = arith.constant 0 : index
    %c0_1 = arith.constant 0 : index
    %0 = vector.load %arg1[%c0, %c0_0, %c0_1] : memref<8x16x128xbf16, #tpu.memory_space<vmem>>, vector<8x16x128xbf16>
    %1 = vector.shape_cast %0 : vector<8x16x128xbf16> to vector<128x128xbf16>
    %c0_2 = arith.constant 0 : index
    %c0_3 = arith.constant 0 : index
    %2 = vector.load %arg2[%c0_2, %c0_3] : memref<128x1024xbf16, #tpu.memory_space<vmem>>, vector<128x1024xbf16>
    %cst = arith.constant dense<0.000000e+00> : vector<128x1024xf32>
    %3 = tpu.matmul %1, %2, %cst {dimension_numbers = #tpu.dot_dimension_numbers<[1], [0], [0], [1], [0, 0, 1, 1], [], []>} : vector<128x128xbf16>, vector<128x1024xbf16>, vector<128x1024xf32> -> vector<128x1024xf32>
    %c0_4 = arith.constant 0 : index
    %c0_5 = arith.constant 0 : index
    %4 = vector.load %arg3[%c0_4, %c0_5] : memref<1x1024xf32, #tpu.memory_space<vmem>>, vector<1x1024xf32>
    %5 = vector.broadcast %4 : vector<1x1024xf32> to vector<128x1024xf32>
    %6 = arith.addf %3, %5 : vector<128x1024xf32>
    %7 = vector.shape_cast %6 : vector<128x1024xf32> to vector<8x16x1024xf32>
    %8 = arith.truncf %7 : vector<8x16x1024xf32> to vector<8x16x1024xbf16>
    %c0_6 = arith.constant 0 : index
    %c0_7 = arith.constant 0 : index
    %c0_8 = arith.constant 0 : index
    %9 = vector.load %arg4[%c0_6, %c0_7, %c0_8] : memref<8x16x1024xbf16, #tpu.memory_space<vmem>>, vector<8x16x1024xbf16>
    tpu.vector_store %arg4[%c0_6, %c0_7, %c0_8], %8 {strides = array<i32>} : memref<8x16x1024xbf16, #tpu.memory_space<vmem>>, vector<8x16x1024xbf16>,
    return
  }
  func.func @transform_0(%arg0: i32) -> (i32, i32, i32) {
    %c0_i32 = arith.constant 0 : i32
    %c0_i32_0 = arith.constant 0 : i32
    %c0_i32_1 = arith.constant 0 : i32
    return %arg0, %c0_i32, %c0_i32_0 : i32, i32, i32
  }
  func.func @transform_1(%arg0: i32) -> (i32, i32) {
    %c0_i32 = arith.constant 0 : i32
    %c0_i32_0 = arith.constant 0 : i32
    %c0_i32_1 = arith.constant 0 : i32
    return %c0_i32, %c0_i32_0 : i32, i32
  }
  func.func @transform_2(%arg0: i32) -> (i32, i32) {
    %c0_i32 = arith.constant 0 : i32
    %c0_i32_0 = arith.constant 0 : i32
    %c0_i32_1 = arith.constant 0 : i32
    return %c0_i32, %c0_i32_0 : i32, i32
  }
  func.func @transform_3(%arg0: i32) -> (i32, i32, i32) {
    %c0_i32 = arith.constant 0 : i32
    %c0_i32_0 = arith.constant 0 : i32
    %c0_i32_1 = arith.constant 0 : i32
    return %arg0, %c0_i32, %c0_i32_0 : i32, i32, i32
  }
}

</mosaic_0001>

<bundles_post_ra>
// kernel: tpu_custom_call.1
= control target key start
LH: loop header
LB: loop body
LE: loop exit
PB: predicated region body
PF: predicated region fallthrough
CT: control target
= control target key end

     0   :  { %8 = vsyncpa [#allocation3], 0  ;;  %s2027_s0 = inlined_call_operand.hbm [shape: bf16[8,16,128], index: 0, kind: input, shape index: {}]   ;;  %s2028_s1 = inlined_call_operand.hbm [shape: bf16[128,1024], index: 1, kind: input, shape index: {}]   ;;  %s2029_s2 = inlined_call_operand.hbm [shape: f32[1,1024], index: 2, kind: input, shape index: {}]   ;;  %s2030_s3 = inlined_call_operand.hbm [shape: bf16[8,16,1024], index: 3, kind: output, shape index: {}]  }
   0x1   :  { %9 = vsyncpa [#allocation6], 0 }
   0x2   :  { %10 = vsyncpa [#allocation4], 0  ;;  %s1766_s12 = smov [#allocation5]  }
   0x3   :  { %s28_s13 = sshll.u32 %s1766_s12, 4  ;;  %s29_s13 = int_to_ptr.vmem [resolvable:$true] %s28_s13 }
   0x4   :  { %s1688_s14 = scalar_lea.vmem %s29_s13, 8192  ;;  %p1693_p1 = scmp.lt.s32.totalorder %s29_s13, %s29_s13 }
   0x5   :  { %p1689_p0 = scmp.ne.s32.totalorder %s29_s13, %s1688_s14  ;;  %p1694_p2 = scmp.lt.s32.totalorder %s1688_s14, %s1688_s14 }
   0x7   :  { %p1695_p3 = por %p1694_p2, %p1693_p1 }
   0x9   :  { %p1696_p4 = pnand %p1695_p3, %p1689_p0 }
   0xb   :  { %1699 = shalt.err (!%p1696_p4)
}
   0xc   :  { %s1767_s15 = smov 512   ;;  %s1768_s16 = smov 32  }
   0xd   :  { %34 = dma.hbm_to_vmem [thread:$0]  %s2028_s1, 8192, %s29_s13, [#allocation6], %s1767_s15, %s1767_s15, %s1768_s16  }
   0xe   :  { %s1769_s19 = smov [#allocation2]  }
   0xf   :  { %s16_s20 = sshll.u32 %s1769_s19, 4  ;;  %s17_s20 = int_to_ptr.vmem [resolvable:$true] %s16_s20 }
  0x10   :  { %s1708_s21 = scalar_lea.vmem %s17_s20, 1024  ;;  %p1713_p6 = scmp.lt.s32.totalorder %s17_s20, %s17_s20 }
  0x11   :  { %p1709_p5 = scmp.ne.s32.totalorder %s17_s20, %s1708_s21  ;;  %p1714_p7 = scmp.lt.s32.totalorder %s1708_s21, %s1708_s21 }
  0x13   :  { %p1715_p8 = por %p1714_p7, %p1713_p6 }
  0x15   :  { %p1716_p9 = pnand %p1715_p8, %p1709_p5 }
  0x17   :  { %1719 = shalt.err (!%p1716_p9)
}
  0x18   :  { %s1770_s22 = smov 64   ;;  %s1771_s23 = smov 4  }
  0x19   :  { %22 = dma.hbm_to_vmem [thread:$0]  %s2027_s0, 1024, %s17_s20, [#allocation3], %s1770_s22, %s1770_s22, %s1771_s23  }
  0x1a   :  { %s1772_s26 = smov [#allocation7]  }
  0x1b   :  { %s41_s27 = sshll.u32 %s1772_s26, 4  ;;  %s42_s27 = int_to_ptr.vmem [resolvable:$true] %s41_s27 }
  0x1c   :  { %s1728_s1 = scalar_lea.vmem %s42_s27, 128  ;;  %p1733_p11 = scmp.lt.s32.totalorder %s42_s27, %s42_s27 }
  0x1d   :  { %p1729_p10 = scmp.ne.s32.totalorder %s42_s27, %s1728_s1  ;;  %p1734_p12 = scmp.lt.s32.totalorder %s1728_s1, %s1728_s1 }
  0x1f   :  { %p1735_p13 = por %p1734_p12, %p1733_p11 }
  0x21   :  { %p1736_p0 = pnand %p1735_p13, %p1729_p10 }
  0x23   :  { %1739 = shalt.err (!%p1736_p0)
}
  0x24   :  { %44 = dma.hbm_to_vmem [thread:$0]  %s2029_s2, 128, %s42_s27, [#allocation6]  }
  0x25   :  { %1760 = dma.done.wait [#allocation3], 1024  }
  0x26   :  { %1761 = vsyncadd [#allocation3], 4294966272 }
  0x27   :  { %1762 = dma.done.wait [#allocation6], 8320  }
  0x28   :  { %1763 = vsyncadd [#allocation6], 4294958976  ;;  %v1773_v0 = vmov 0   ;;  %v127_v1 = vld [vmem:[#allocation5 + $0x1c0] sm:$0xff]  ;;  %v128_v3 = vld [vmem:[#allocation5 + $0x1c8] sm:$0xff]  ;;  %s1774_s0 = smov [#allocation8]  }
  0x29   :  { %577 = vmatprep.mubr.bf16.mxu0 %v1773_v0  ;;  %690 = vmatprep.mubr.bf16.mxu1 %v1773_v0  ;;  %v131_v2 = vld [vmem:[#allocation5 + $0x1e0] sm:$0xff]  ;;  %v132_v5 = vld [vmem:[#allocation5 + $0x1e8] sm:$0xff]  ;;  %v129_v63 = vld [vmem:[#allocation5 + $0x1d0] sm:$0xff]  ;;  %s1450_s2 = sshll.u32 %s1774_s0, 4  ;;  %s1451_s2 = int_to_ptr.vmem [resolvable:$true] %s1450_s2 }
  0x2a   :  { %v1528_v4 = vcombine.high %v127_v1, %v131_v2  ;;  %v1527_v6 = vcombine.low %v127_v1, %v131_v2  ;;  %v119_v7 = vld [vmem:[#allocation5 + $0x180] sm:$0xff]  ;;  %v1530_v9 = vcombine.high %v128_v3, %v132_v5  ;;  %v1529_v10 = vcombine.low %v128_v3, %v132_v5  ;;  %v120_v12 = vld [vmem:[#allocation5 + $0x188] sm:$0xff]  ;;  %v133_v1 = vld [vmem:[#allocation5 + $0x1f0] sm:$0xff]  ;;  %s1740_s30 = scalar_lea.vmem %s1451_s2, 8192  ;;  %p1745_p2 = scmp.lt.s32.totalorder %s1451_s2, %s1451_s2 }
  0x2b   :  { %v123_v8 = vld [vmem:[#allocation5 + $0x1a0] sm:$0xff]  ;;  %v124_v13 = vld [vmem:[#allocation5 + $0x1a8] sm:$0xff]  ;;  %v130_v2 = vld [vmem:[#allocation5 + $0x1d8] sm:$0xff]  ;;  %p1741_p1 = scmp.ne.s32.totalorder %s1451_s2, %s1740_s30  ;;  %p1746_p3 = scmp.lt.s32.totalorder %s1740_s30, %s1740_s30 }
  0x2c   :  { %v1520_v11 = vcombine.high %v119_v7, %v123_v8  ;;  %v111_v14 = vld [vmem:[#allocation5 + $0x140] sm:$0xff]  ;;  %545 = vmatprep.subr.bf16.mxu0 %v1528_v4  ;;  %v1522_v15 = vcombine.high %v120_v12, %v124_v13  ;;  %v112_v17 = vld [vmem:[#allocation5 + $0x148] sm:$0xff]  ;;  %658 = vmatprep.subr.bf16.mxu1 %v1530_v9  ;;  %v1519_v19 = vcombine.low %v119_v7, %v123_v8  ;;  %v134_v3 = vld [vmem:[#allocation5 + $0x1f8] sm:$0xff] }
  0x2d   :  { %v115_v16 = vld [vmem:[#allocation5 + $0x160] sm:$0xff]  ;;  %v116_v18 = vld [vmem:[#allocation5 + $0x168] sm:$0xff]  ;;  %546 = vmatpush1.bf16.msra.mxu0 %v1527_v6  ;;  %659 = vmatpush1.bf16.msra.mxu1 %v1529_v10  ;;  %v1521_v20 = vcombine.low %v120_v12, %v124_v13  ;;  %v1532_v6 = vcombine.high %v129_v63, %v133_v1  ;;  %v1534_v7 = vcombine.high %v130_v2, %v134_v3  ;;  %v121_v9 = vld [vmem:[#allocation5 + $0x190] sm:$0xff]  ;;  %p1747_p4 = por %p1746_p3, %p1745_p2 }
  0x2e   :  { %547 = vmatprep.subr.bf16.mxu0 %v1520_v11  ;;  %v1512_v21 = vcombine.high %v111_v14, %v115_v16  ;;  %660 = vmatprep.subr.bf16.mxu1 %v1522_v15  ;;  %v1514_v22 = vcombine.high %v112_v17, %v116_v18  ;;  %v103_v23 = vld [vmem:[#allocation5 + $0x100] sm:$0xff]  ;;  %v104_v25 = vld [vmem:[#allocation5 + $0x108] sm:$0xff]  ;;  %v1511_v27 = vcombine.low %v111_v14, %v115_v16  ;;  %v125_v10 = vld [vmem:[#allocation5 + $0x1b0] sm:$0xff] }
  0x2f   :  { %v107_v24 = vld [vmem:[#allocation5 + $0x120] sm:$0xff]  ;;  %v108_v26 = vld [vmem:[#allocation5 + $0x128] sm:$0xff]  ;;  %v1513_v28 = vcombine.low %v112_v17, %v116_v18  ;;  %v1531_v11 = vcombine.low %v129_v63, %v133_v1  ;;  %v122_v12 = vld [vmem:[#allocation5 + $0x198] sm:$0xff]  ;;  %v1533_v14 = vcombine.low %v130_v2, %v134_v3  ;;  %v1524_v15 = vcombine.high %v121_v9, %v125_v10  ;;  %p1748_p5 = pnand %p1747_p4, %p1741_p1 }
  0x30   :  { %v1504_v29 = vcombine.high %v103_v23, %v107_v24  ;;  %v1506_v30 = vcombine.high %v104_v25, %v108_v26  ;;  %v95_v31 = vld [vmem:[#allocation5 + $0xc0] sm:$0xff]  ;;  %v96_v33 = vld [vmem:[#allocation5 + $0xc8] sm:$0xff]  ;;  %v1503_v35 = vcombine.low %v103_v23, %v107_v24  ;;  %v1505_v36 = vcombine.low %v104_v25, %v108_v26  ;;  %v126_v13 = vld [vmem:[#allocation5 + $0x1b8] sm:$0xff] }
  0x31   :  { %548 = vmatpush1.bf16.msra.mxu0 %v1519_v19  ;;  %661 = vmatpush1.bf16.msra.mxu1 %v1521_v20  ;;  %v99_v32 = vld [vmem:[#allocation5 + $0xe0] sm:$0xff]  ;;  %v100_v34 = vld [vmem:[#allocation5 + $0xe8] sm:$0xff]  ;;  %v113_v16 = vld [vmem:[#allocation5 + $0x150] sm:$0xff]  ;;  %v1526_v18 = vcombine.high %v122_v12, %v126_v13 }
  0x32   :  { %549 = vmatprep.subr.bf16.mxu0 %v1512_v21  ;;  %662 = vmatprep.subr.bf16.mxu1 %v1514_v22  ;;  %v1496_v37 = vcombine.high %v95_v31, %v99_v32  ;;  %v1498_v38 = vcombine.high %v96_v33, %v100_v34  ;;  %v87_v39 = vld [vmem:[#allocation5 + $0x80] sm:$0xff]  ;;  %v88_v41 = vld [vmem:[#allocation5 + $0x88] sm:$0xff]  ;;  %v1495_v43 = vcombine.low %v95_v31, %v99_v32  ;;  %v117_v17 = vld [vmem:[#allocation5 + $0x170] sm:$0xff] }
  0x33   :  { %v91_v40 = vld [vmem:[#allocation5 + $0xa0] sm:$0xff]  ;;  %v92_v42 = vld [vmem:[#allocation5 + $0xa8] sm:$0xff]  ;;  %v1497_v44 = vcombine.low %v96_v33, %v100_v34  ;;  %v114_v19 = vld [vmem:[#allocation5 + $0x158] sm:$0xff]  ;;  %v1523_v21 = vcombine.low %v121_v9, %v125_v10  ;;  %v1525_v22 = vcombine.low %v122_v12, %v126_v13  ;;  %v1516_v23 = vcombine.high %v113_v16, %v117_v17 }
  0x34   :  { %v1488_v45 = vcombine.high %v87_v39, %v91_v40  ;;  %v1490_v46 = vcombine.high %v88_v41, %v92_v42  ;;  %v79_v47 = vld [vmem:[#allocation5 + $0x40] sm:$0xff]  ;;  %v80_v49 = vld [vmem:[#allocation5 + $0x48] sm:$0xff]  ;;  %v1487_v51 = vcombine.low %v87_v39, %v91_v40  ;;  %v1489_v52 = vcombine.low %v88_v41, %v92_v42  ;;  %v118_v20 = vld [vmem:[#allocation5 + $0x178] sm:$0xff] }
  0x35   :  { %550 = vmatpush1.bf16.msra.mxu0 %v1511_v27  ;;  %663 = vmatpush1.bf16.msra.mxu1 %v1513_v28  ;;  %v83_v48 = vld [vmem:[#allocation5 + $0x60] sm:$0xff]  ;;  %v84_v50 = vld [vmem:[#allocation5 + $0x68] sm:$0xff]  ;;  %v1518_v24 = vcombine.high %v114_v19, %v118_v20  ;;  %v105_v26 = vld [vmem:[#allocation5 + $0x110] sm:$0xff]  ;;  %v1517_v31 = vcombine.low %v114_v19, %v118_v20 }
  0x36   :  { %551 = vmatprep.subr.bf16.mxu0 %v1504_v29  ;;  %664 = vmatprep.subr.bf16.mxu1 %v1506_v30  ;;  %v1480_v53 = vcombine.high %v79_v47, %v83_v48  ;;  %v71_v54 = vld [vmem:[#allocation5] sm:$0xff]  ;;  %v1482_v55 = vcombine.high %v80_v49, %v84_v50  ;;  %v72_v57 = vld [vmem:[#allocation5 + $0x8] sm:$0xff]  ;;  %v1479_v59 = vcombine.low %v79_v47, %v83_v48  ;;  %v109_v27 = vld [vmem:[#allocation5 + $0x130] sm:$0xff] }
  0x37   :  { %v75_v56 = vld [vmem:[#allocation5 + $0x20] sm:$0xff]  ;;  %v76_v58 = vld [vmem:[#allocation5 + $0x28] sm:$0xff]  ;;  %v1481_v60 = vcombine.low %v80_v49, %v84_v50  ;;  %v106_v28 = vld [vmem:[#allocation5 + $0x118] sm:$0xff]  ;;  %v1515_v30 = vcombine.low %v113_v16, %v117_v17  ;;  %v1508_v32 = vcombine.high %v105_v26, %v109_v27 }
  0x38   :  { %v1472_v61 = vcombine.high %v71_v54, %v75_v56  ;;  %v1474_v62 = vcombine.high %v72_v57, %v76_v58  ;;  %v1471_v4 = vcombine.low %v71_v54, %v75_v56  ;;  %v1473_v5 = vcombine.low %v72_v57, %v76_v58  ;;  %v1809_v8 = vld [vmem:[#allocation2] sm:$0xff]   ;;  %v1815_v25 = vld [vmem:[#allocation2 + $0x8] sm:$0xff]   ;;  %v110_v29 = vld [vmem:[#allocation5 + $0x138] sm:$0xff] }
  0x39   :  { %552 = vmatpush1.bf16.msra.mxu0 %v1503_v35  ;;  %665 = vmatpush1.bf16.msra.mxu1 %v1505_v36  ;;  %v1510_v33 = vcombine.high %v106_v28, %v110_v29  ;;  %v97_v34 = vld [vmem:[#allocation5 + $0xd0] sm:$0xff]  ;;  %v98_v36 = vld [vmem:[#allocation5 + $0xd8] sm:$0xff]  ;;  %v1509_v39 = vcombine.low %v106_v28, %v110_v29  ;;  %v1677_v9 = vld [vmem:[#allocation2 + $0x28] sm:$0xff]  }
  0x3a   :  { %553 = vmatprep.subr.bf16.mxu0 %v1496_v37  ;;  %666 = vmatprep.subr.bf16.mxu1 %v1498_v38  ;;  %v101_v35 = vld [vmem:[#allocation5 + $0xf0] sm:$0xff]  ;;  %v102_v37 = vld [vmem:[#allocation5 + $0xf8] sm:$0xff]  ;;  %v1507_v38 = vcombine.low %v105_v26, %v109_v27 }
  0x3b   :  { %v1500_v40 = vcombine.high %v97_v34, %v101_v35  ;;  %v1821_v41 = vld [vmem:[#allocation2 + $0x10] sm:$0xff]   ;;  %v1502_v42 = vcombine.high %v98_v36, %v102_v37  ;;  %v1499_v47 = vcombine.low %v97_v34, %v101_v35  ;;  %v1501_v48 = vcombine.low %v98_v36, %v102_v37  ;;  %v86_v54 = vld [vmem:[#allocation5 + $0x78] sm:$0xff] }
  0x3c   :  { %v1675_v58 = vld [vmem:[#allocation2 + $0x18] sm:$0xff]   ;;  %v1678_v10 = vld [vmem:[#allocation2 + $0x30] sm:$0xff]  }
  0x3d   :  { %554 = vmatpush1.bf16.msra.mxu0 %v1495_v43  ;;  %667 = vmatpush1.bf16.msra.mxu1 %v1497_v44  ;;  %v89_v43 = vld [vmem:[#allocation5 + $0x90] sm:$0xff]  ;;  %v78_v63 = vld [vmem:[#allocation5 + $0x38] sm:$0xff] }
  0x3e   :  { %555 = vmatprep.subr.bf16.mxu0 %v1488_v45  ;;  %668 = vmatprep.subr.bf16.mxu1 %v1490_v46  ;;  %v93_v44 = vld [vmem:[#allocation5 + $0xb0] sm:$0xff]  ;;  %v90_v45 = vld [vmem:[#allocation5 + $0x98] sm:$0xff] }
  0x3f   :  { %v94_v46 = vld [vmem:[#allocation5 + $0xb8] sm:$0xff]  ;;  %v1492_v49 = vcombine.high %v89_v43, %v93_v44 }
  0x40   :  { %v1494_v50 = vcombine.high %v90_v45, %v94_v46  ;;  %v1493_v56 = vcombine.low %v90_v45, %v94_v46 }
  0x41   :  { %556 = vmatpush1.bf16.msra.mxu0 %v1487_v51  ;;  %669 = vmatpush1.bf16.msra.mxu1 %v1489_v52  ;;  %v81_v51 = vld [vmem:[#allocation5 + $0x50] sm:$0xff] }
  0x42   :  { %557 = vmatprep.subr.bf16.mxu0 %v1480_v53  ;;  %670 = vmatprep.subr.bf16.mxu1 %v1482_v55  ;;  %v85_v52 = vld [vmem:[#allocation5 + $0x70] sm:$0xff]  ;;  %v82_v53 = vld [vmem:[#allocation5 + $0x58] sm:$0xff]  ;;  %v1491_v55 = vcombine.low %v89_v43, %v93_v44 }
  0x43   :  { %v1484_v57 = vcombine.high %v81_v51, %v85_v52  ;;  %v1483_v1 = vcombine.low %v81_v51, %v85_v52  ;;  %v1485_v2 = vcombine.low %v82_v53, %v86_v54 }
  0x45   :  { %558 = vmatpush1.bf16.msra.mxu0 %v1479_v59  ;;  %671 = vmatpush1.bf16.msra.mxu1 %v1481_v60  ;;  %v1486_v59 = vcombine.high %v82_v53, %v86_v54  ;;  %v73_v60 = vld [vmem:[#allocation5 + $0x10] sm:$0xff] }
  0x46   :  { %559 = vmatprep.subr.bf16.mxu0 %v1472_v61  ;;  %672 = vmatprep.subr.bf16.mxu1 %v1474_v62  ;;  %v77_v61 = vld [vmem:[#allocation5 + $0x30] sm:$0xff]  ;;  %v74_v62 = vld [vmem:[#allocation5 + $0x18] sm:$0xff] }
  0x47   :  { %v1476_v3 = vcombine.high %v73_v60, %v77_v61 }
  0x49   :  { %560 = vmatpush1.bf16.msra.mxu0 %v1471_v4  ;;  %673 = vmatpush1.bf16.msra.mxu1 %v1473_v5  ;;  %v1478_v4 = vcombine.high %v74_v62, %v78_v63  ;;  %v1475_v5 = vcombine.low %v73_v60, %v77_v61 }
  0x4a   :  { %771 = vmatprep.subr.bf16.mxu0 %v1532_v6  ;;  %884 = vmatprep.subr.bf16.mxu1 %v1534_v7  ;;  %v1477_v6 = vcombine.low %v74_v62, %v78_v63  ;;  %v1676_v7 = vld [vmem:[#allocation2 + $0x20] sm:$0xff]  }
  0x4c   :  { %578 = vmatmul.mubr.bf16.vlgmr.msra.gmra.mxu0 %v1809_v8  ;;  %691 = vmatmul.mubr.bf16.vlgmr.msra.gmra.mxu1 %v1809_v8 }
  0x4d   :  { %772 = vmatpush1.bf16.msra.mxu0 %v1531_v11  ;;  %885 = vmatpush1.bf16.msra.mxu1 %v1533_v14  ;;  %v1679_v11 = vld [vmem:[#allocation2 + $0x38] sm:$0xff]  }
  0x4e   :  { %587 = vmatprep.mubr.bf16.mxu0 %v1773_v0  ;;  %700 = vmatprep.mubr.bf16.mxu1 %v1773_v0 }
  0x4f   :  { %773 = vmatprep.subr.bf16.mxu0 %v1524_v15  ;;  %886 = vmatprep.subr.bf16.mxu1 %v1526_v18  ;;  %v1861_v15 = vld [vmem:[#allocation7] sm:$0xff] }
  0x51   :  { %774 = vmatpush1.bf16.msra.mxu0 %v1523_v21  ;;  %887 = vmatpush1.bf16.msra.mxu1 %v1525_v22 }
  0x52   :  { %775 = vmatprep.subr.bf16.mxu0 %v1516_v23  ;;  %888 = vmatprep.subr.bf16.mxu1 %v1518_v24 }
  0x54   :  { %588 = vmatmul.mubr.bf16.gmra.mxu0 %v1815_v25  ;;  %701 = vmatmul.mubr.bf16.gmra.mxu1 %v1815_v25 }
  0x55   :  { %597 = vmatprep.mubr.bf16.mxu0 %v1773_v0  ;;  %710 = vmatprep.mubr.bf16.mxu1 %v1773_v0 }
  0x56   :  { %776 = vmatpush1.bf16.msra.mxu0 %v1515_v30  ;;  %889 = vmatpush1.bf16.msra.mxu1 %v1517_v31 }
  0x57   :  { %777 = vmatprep.subr.bf16.mxu0 %v1508_v32  ;;  %890 = vmatprep.subr.bf16.mxu1 %v1510_v33 }
  0x5a   :  { %778 = vmatpush1.bf16.msra.mxu0 %v1507_v38  ;;  %891 = vmatpush1.bf16.msra.mxu1 %v1509_v39 }
  0x5b   :  { %779 = vmatprep.subr.bf16.mxu0 %v1500_v40  ;;  %892 = vmatprep.subr.bf16.mxu1 %v1502_v42 }
  0x5c   :  { %598 = vmatmul.mubr.bf16.gmra.mxu0 %v1821_v41  ;;  %711 = vmatmul.mubr.bf16.gmra.mxu1 %v1821_v41 }
  0x5d   :  { %607 = vmatprep.mubr.bf16.mxu0 %v1773_v0  ;;  %720 = vmatprep.mubr.bf16.mxu1 %v1773_v0 }
  0x5e   :  { %780 = vmatpush1.bf16.msra.mxu0 %v1499_v47  ;;  %893 = vmatpush1.bf16.msra.mxu1 %v1501_v48 }
  0x5f   :  { %781 = vmatprep.subr.bf16.mxu0 %v1492_v49  ;;  %894 = vmatprep.subr.bf16.mxu1 %v1494_v50 }
  0x62   :  { %782 = vmatpush1.bf16.msra.mxu0 %v1491_v55  ;;  %895 = vmatpush1.bf16.msra.mxu1 %v1493_v56 }
  0x63   :  { %783 = vmatprep.subr.bf16.mxu0 %v1484_v57  ;;  %896 = vmatprep.subr.bf16.mxu1 %v1486_v59 }
  0x64   :  { %608 = vmatmul.mubr.bf16.gmra.mxu0 %v1675_v58  ;;  %721 = vmatmul.mubr.bf16.gmra.mxu1 %v1675_v58 }
  0x65   :  { %617 = vmatprep.mubr.bf16.mxu0 %v1773_v0  ;;  %730 = vmatprep.mubr.bf16.mxu1 %v1773_v0 }
  0x66   :  { %784 = vmatpush1.bf16.msra.mxu0 %v1483_v1  ;;  %897 = vmatpush1.bf16.msra.mxu1 %v1485_v2 }
  0x67   :  { %785 = vmatprep.subr.bf16.mxu0 %v1476_v3  ;;  %898 = vmatprep.subr.bf16.mxu1 %v1478_v4 }
  0x6a   :  { %786 = vmatpush1.bf16.msra.mxu0 %v1475_v5  ;;  %899 = vmatpush1.bf16.msra.mxu1 %v1477_v6 }
  0x6c   :  { %618 = vmatmul.mubr.bf16.gmra.mxu0 %v1676_v7  ;;  %731 = vmatmul.mubr.bf16.gmra.mxu1 %v1676_v7 }
  0x6d   :  { %627 = vmatprep.mubr.bf16.mxu0 %v1773_v0  ;;  %740 = vmatprep.mubr.bf16.mxu1 %v1773_v0 }
  0x74   :  { %628 = vmatmul.mubr.bf16.gmra.mxu0 %v1677_v9  ;;  %741 = vmatmul.mubr.bf16.gmra.mxu1 %v1677_v9 }
  0x75   :  { %637 = vmatprep.mubr.bf16.mxu0 %v1773_v0  ;;  %750 = vmatprep.mubr.bf16.mxu1 %v1773_v0 }
  0x7c   :  { %638 = vmatmul.mubr.bf16.gmra.mxu0 %v1678_v10  ;;  %751 = vmatmul.mubr.bf16.gmra.mxu1 %v1678_v10 }
  0x7d   :  { %647 = vmatprep.mubr.bf16.mxu0 %v1773_v0  ;;  %760 = vmatprep.mubr.bf16.mxu1 %v1773_v0 }
  0x84   :  { %648 = vmatmul.mubr.bf16.gmra.mxu0 %v1679_v11  ;;  %761 = vmatmul.mubr.bf16.gmra.mxu1 %v1679_v11 }
  0x85   :  { %803 = vmatprep.mubr.bf16.mxu0 %v1773_v0  ;;  %916 = vmatprep.mubr.bf16.mxu1 %v1773_v0 }
  0x8c   :  { %804 = vmatmul.mubr.bf16.vlgmr.msra.gmra.mxu0 %v1809_v8  ;;  %917 = vmatmul.mubr.bf16.vlgmr.msra.gmra.mxu1 %v1809_v8  ;;  %v137_v8 = vlaneseq }
  0x8d   :  { %813 = vmatprep.mubr.bf16.mxu0 %v1773_v0  ;;  %926 = vmatprep.mubr.bf16.mxu1 %v1773_v0 }
  0x8e   :  { %v1857_v12 = vshrl.u32 %v137_v8, 7 }
  0x90   :  { %v139_v13 = vsub.s32 0, %v1857_v12  ;;  %v143_v14 = vsub.s32 1, %v1857_v12  ;;  %v147_v16 = vsub.s32 2, %v1857_v12  ;;  %v151_v17 = vsub.s32 3, %v1857_v12 }
  0x92   :  { %v1866_v18 = vrot.slane %v1861_v15, %v139_v13  ;;  %v1872_v20 = vrot.slane %v1861_v15, %v147_v16  ;;  %v1875_v21 = vrot.slane %v1861_v15, %v151_v17 }
  0x94   :  { %814 = vmatmul.mubr.bf16.gmra.mxu0 %v1815_v25  ;;  %927 = vmatmul.mubr.bf16.gmra.mxu1 %v1815_v25 }
  0x95   :  { %823 = vmatprep.mubr.bf16.mxu0 %v1773_v0  ;;  %936 = vmatprep.mubr.bf16.mxu1 %v1773_v0 }
  0x9c   :  { %824 = vmatmul.mubr.bf16.gmra.mxu0 %v1821_v41  ;;  %937 = vmatmul.mubr.bf16.gmra.mxu1 %v1821_v41 }
  0x9d   :  { %833 = vmatprep.mubr.bf16.mxu0 %v1773_v0  ;;  %946 = vmatprep.mubr.bf16.mxu1 %v1773_v0 }
  0xa4   :  { %834 = vmatmul.mubr.bf16.gmra.mxu0 %v1675_v58  ;;  %947 = vmatmul.mubr.bf16.gmra.mxu1 %v1675_v58 }
  0xa5   :  { %843 = vmatprep.mubr.bf16.mxu0 %v1773_v0  ;;  %956 = vmatprep.mubr.bf16.mxu1 %v1773_v0 }
  0xac   :  { %844 = vmatmul.mubr.bf16.gmra.mxu0 %v1676_v7  ;;  %957 = vmatmul.mubr.bf16.gmra.mxu1 %v1676_v7 }
  0xad   :  { %853 = vmatprep.mubr.bf16.mxu0 %v1773_v0  ;;  %966 = vmatprep.mubr.bf16.mxu1 %v1773_v0 }
  0xb4   :  { %854 = vmatmul.mubr.bf16.gmra.mxu0 %v1677_v9  ;;  %967 = vmatmul.mubr.bf16.gmra.mxu1 %v1677_v9 }
  0xb5   :  { %863 = vmatprep.mubr.bf16.mxu0 %v1773_v0  ;;  %976 = vmatprep.mubr.bf16.mxu1 %v1773_v0 }
  0xbc   :  { %864 = vmatmul.mubr.bf16.gmra.mxu0 %v1678_v10  ;;  %977 = vmatmul.mubr.bf16.gmra.mxu1 %v1678_v10 }
  0xbd   :  { %873 = vmatprep.mubr.bf16.mxu0 %v1773_v0  ;;  %986 = vmatprep.mubr.bf16.mxu1 %v1773_v0  ;;  %v1869_v0 = vrot.slane %v1861_v15, %v143_v14 }
  0xc4   :  { %874 = vmatmul.mubr.bf16.gmra.mxu0 %v1679_v11  ;;  %987 = vmatmul.mubr.bf16.gmra.mxu1 %v1679_v11 }
 0x10c   :  { %v579_v19 = vpop.f32.mrf.mxu0  ;;  %v692_v22 = vpop.f32.mrf.mxu1 }
 0x10d   :  { %v580_v24 = vadd.f32 %v579_v19, %v1866_v18  ;;  %v693_v27 = vadd.f32 %v692_v22, %v1872_v20 }
 0x10e   :  { %v581_v23 = vpop.f32.mrf.mxu0  ;;  %v694_v26 = vpop.f32.mrf.mxu1 }
 0x10f   :  { %v582_v25 = vadd.f32 %v581_v23, %v1869_v0  ;;  %v695_v28 = vadd.f32 %v694_v26, %v1875_v21 }
 0x110   :  { %v583_v29 = vpop.f32.mrf.mxu0  ;;  %v696_v31 = vpop.f32.mrf.mxu1 }
 0x111   :  { %v1599_v30 = vpack.c.bf16 %v582_v25, %v580_v24  ;;  %v1600_v32 = vpack.c.bf16 %v695_v28, %v693_v27  ;;  %v584_v34 = vadd.f32 %v583_v29, %v1866_v18  ;;  %v697_v37 = vadd.f32 %v696_v31, %v1872_v20 }
 0x112   :  { %v585_v33 = vpop.f32.mrf.mxu0  ;;  %v698_v36 = vpop.f32.mrf.mxu1 }
 0x113   :  { %1381 = vst [vmem:[#allocation8] sm:$0xff] %v1599_v30  ;;  %v586_v35 = vadd.f32 %v585_v33, %v1869_v0  ;;  %1382 = vst [vmem:[#allocation8 + $0x8] sm:$0xff] %v1600_v32  ;;  %v699_v38 = vadd.f32 %v698_v36, %v1875_v21 }
 0x114   :  { %v589_v39 = vpop.f32.mrf.mxu0  ;;  %v702_v41 = vpop.f32.mrf.mxu1 }
 0x115   :  { %v1603_v40 = vpack.c.bf16 %v586_v35, %v584_v34  ;;  %v1604_v42 = vpack.c.bf16 %v699_v38, %v697_v37  ;;  %v590_v44 = vadd.f32 %v589_v39, %v1866_v18  ;;  %v703_v47 = vadd.f32 %v702_v41, %v1872_v20 }
 0x116   :  { %v591_v43 = vpop.f32.mrf.mxu0  ;;  %v704_v46 = vpop.f32.mrf.mxu1 }
 0x117   :  { %1385 = vst [vmem:[#allocation8 + $0x20] sm:$0xff] %v1603_v40  ;;  %v592_v45 = vadd.f32 %v591_v43, %v1869_v0  ;;  %1386 = vst [vmem:[#allocation8 + $0x28] sm:$0xff] %v1604_v42  ;;  %v705_v48 = vadd.f32 %v704_v46, %v1875_v21 }
 0x118   :  { %v593_v49 = vpop.f32.mrf.mxu0  ;;  %v706_v51 = vpop.f32.mrf.mxu1 }
 0x119   :  { %v1607_v50 = vpack.c.bf16 %v592_v45, %v590_v44  ;;  %v1608_v52 = vpack.c.bf16 %v705_v48, %v703_v47  ;;  %v594_v54 = vadd.f32 %v593_v49, %v1866_v18  ;;  %v707_v57 = vadd.f32 %v706_v51, %v1872_v20 }
 0x11a   :  { %v595_v53 = vpop.f32.mrf.mxu0  ;;  %v708_v56 = vpop.f32.mrf.mxu1 }
 0x11b   :  { %1389 = vst [vmem:[#allocation8 + $0x40] sm:$0xff] %v1607_v50  ;;  %v596_v55 = vadd.f32 %v595_v53, %v1869_v0  ;;  %1390 = vst [vmem:[#allocation8 + $0x48] sm:$0xff] %v1608_v52  ;;  %v709_v58 = vadd.f32 %v708_v56, %v1875_v21 }
 0x11c   :  { %v599_v59 = vpop.f32.mrf.mxu0  ;;  %v712_v61 = vpop.f32.mrf.mxu1 }
 0x11d   :  { %v1611_v60 = vpack.c.bf16 %v596_v55, %v594_v54  ;;  %v1612_v62 = vpack.c.bf16 %v709_v58, %v707_v57  ;;  %v600_v1 = vadd.f32 %v599_v59, %v1866_v18  ;;  %v713_v4 = vadd.f32 %v712_v61, %v1872_v20 }
 0x11e   :  { %v601_v63 = vpop.f32.mrf.mxu0  ;;  %v714_v3 = vpop.f32.mrf.mxu1 }
 0x11f   :  { %1393 = vst [vmem:[#allocation8 + $0x60] sm:$0xff] %v1611_v60  ;;  %v602_v2 = vadd.f32 %v601_v63, %v1869_v0  ;;  %1394 = vst [vmem:[#allocation8 + $0x68] sm:$0xff] %v1612_v62  ;;  %v715_v5 = vadd.f32 %v714_v3, %v1875_v21 }
 0x120   :  { %v603_v6 = vpop.f32.mrf.mxu0  ;;  %v716_v9 = vpop.f32.mrf.mxu1 }
 0x121   :  { %v1615_v7 = vpack.c.bf16 %v602_v2, %v600_v1  ;;  %v1616_v10 = vpack.c.bf16 %v715_v5, %v713_v4  ;;  %v604_v8 = vadd.f32 %v603_v6, %v1866_v18  ;;  %v717_v16 = vadd.f32 %v716_v9, %v1872_v20 }
 0x122   :  { %v605_v11 = vpop.f32.mrf.mxu0  ;;  %v718_v14 = vpop.f32.mrf.mxu1 }
 0x123   :  { %1397 = vst [vmem:[#allocation8 + $0x80] sm:$0xff] %v1615_v7  ;;  %v606_v13 = vadd.f32 %v605_v11, %v1869_v0  ;;  %1398 = vst [vmem:[#allocation8 + $0x88] sm:$0xff] %v1616_v10  ;;  %v719_v17 = vadd.f32 %v718_v14, %v1875_v21 }
 0x124   :  { %v609_v19 = vpop.f32.mrf.mxu0  ;;  %v722_v23 = vpop.f32.mrf.mxu1 }
 0x125   :  { %v1619_v22 = vpack.c.bf16 %v606_v13, %v604_v8  ;;  %v1620_v24 = vpack.c.bf16 %v719_v17, %v717_v16  ;;  %v610_v26 = vadd.f32 %v609_v19, %v1866_v18  ;;  %v723_v29 = vadd.f32 %v722_v23, %v1872_v20 }
 0x126   :  { %v611_v25 = vpop.f32.mrf.mxu0  ;;  %v724_v28 = vpop.f32.mrf.mxu1 }
 0x127   :  { %1401 = vst [vmem:[#allocation8 + $0xa0] sm:$0xff] %v1619_v22  ;;  %v612_v27 = vadd.f32 %v611_v25, %v1869_v0  ;;  %1402 = vst [vmem:[#allocation8 + $0xa8] sm:$0xff] %v1620_v24  ;;  %v725_v30 = vadd.f32 %v724_v28, %v1875_v21 }
 0x128   :  { %v613_v31 = vpop.f32.mrf.mxu0  ;;  %v726_v33 = vpop.f32.mrf.mxu1 }
 0x129   :  { %v1623_v32 = vpack.c.bf16 %v612_v27, %v610_v26  ;;  %v1624_v34 = vpack.c.bf16 %v725_v30, %v723_v29  ;;  %v614_v36 = vadd.f32 %v613_v31, %v1866_v18  ;;  %v727_v39 = vadd.f32 %v726_v33, %v1872_v20 }
 0x12a   :  { %v615_v35 = vpop.f32.mrf.mxu0  ;;  %v728_v38 = vpop.f32.mrf.mxu1 }
 0x12b   :  { %1405 = vst [vmem:[#allocation8 + $0xc0] sm:$0xff] %v1623_v32  ;;  %v616_v37 = vadd.f32 %v615_v35, %v1869_v0  ;;  %1406 = vst [vmem:[#allocation8 + $0xc8] sm:$0xff] %v1624_v34  ;;  %v729_v40 = vadd.f32 %v728_v38, %v1875_v21 }
 0x12c   :  { %v619_v41 = vpop.f32.mrf.mxu0  ;;  %v732_v43 = vpop.f32.mrf.mxu1 }
 0x12d   :  { %v1627_v42 = vpack.c.bf16 %v616_v37, %v614_v36  ;;  %v1628_v44 = vpack.c.bf16 %v729_v40, %v727_v39  ;;  %v620_v46 = vadd.f32 %v619_v41, %v1866_v18  ;;  %v733_v49 = vadd.f32 %v732_v43, %v1872_v20 }
 0x12e   :  { %v621_v45 = vpop.f32.mrf.mxu0  ;;  %v734_v48 = vpop.f32.mrf.mxu1 }
 0x12f   :  { %1409 = vst [vmem:[#allocation8 + $0xe0] sm:$0xff] %v1627_v42  ;;  %v622_v47 = vadd.f32 %v621_v45, %v1869_v0  ;;  %1410 = vst [vmem:[#allocation8 + $0xe8] sm:$0xff] %v1628_v44  ;;  %v735_v50 = vadd.f32 %v734_v48, %v1875_v21 }
 0x130   :  { %v623_v51 = vpop.f32.mrf.mxu0  ;;  %v736_v53 = vpop.f32.mrf.mxu1 }
 0x131   :  { %v1631_v52 = vpack.c.bf16 %v622_v47, %v620_v46  ;;  %v1632_v54 = vpack.c.bf16 %v735_v50, %v733_v49  ;;  %v624_v56 = vadd.f32 %v623_v51, %v1866_v18  ;;  %v737_v59 = vadd.f32 %v736_v53, %v1872_v20 }
 0x132   :  { %v625_v55 = vpop.f32.mrf.mxu0  ;;  %v738_v58 = vpop.f32.mrf.mxu1  ;;  %v155_v51 = vsub.s32 4, %v1857_v12 }
 0x133   :  { %1413 = vst [vmem:[#allocation8 + $0x100] sm:$0xff] %v1631_v52  ;;  %v626_v57 = vadd.f32 %v625_v55, %v1869_v0  ;;  %1414 = vst [vmem:[#allocation8 + $0x108] sm:$0xff] %v1632_v54  ;;  %v739_v60 = vadd.f32 %v738_v58, %v1875_v21  ;;  %v159_v52 = vsub.s32 5, %v1857_v12 }
 0x134   :  { %v629_v61 = vpop.f32.mrf.mxu0  ;;  %v742_v63 = vpop.f32.mrf.mxu1 }
 0x135   :  { %v1635_v62 = vpack.c.bf16 %v626_v57, %v624_v56  ;;  %v1636_v1 = vpack.c.bf16 %v739_v60, %v737_v59  ;;  %v630_v3 = vadd.f32 %v629_v61, %v1866_v18  ;;  %v743_v6 = vadd.f32 %v742_v63, %v1872_v20 }
 0x136   :  { %v631_v2 = vpop.f32.mrf.mxu0  ;;  %v744_v5 = vpop.f32.mrf.mxu1  ;;  %v163_v56 = vsub.s32 6, %v1857_v12  ;;  %v167_v57 = vsub.s32 7, %v1857_v12 }
 0x137   :  { %1417 = vst [vmem:[#allocation8 + $0x120] sm:$0xff] %v1635_v62  ;;  %v632_v4 = vadd.f32 %v631_v2, %v1869_v0  ;;  %1418 = vst [vmem:[#allocation8 + $0x128] sm:$0xff] %v1636_v1  ;;  %v745_v7 = vadd.f32 %v744_v5, %v1875_v21  ;;  %v1944_v2 = vrot.slane %v1861_v15, %v155_v51 }
 0x138   :  { %v633_v9 = vpop.f32.mrf.mxu0  ;;  %v746_v11 = vpop.f32.mrf.mxu1 }
 0x139   :  { %v1639_v10 = vpack.c.bf16 %v632_v4, %v630_v3  ;;  %v1640_v8 = vpack.c.bf16 %v745_v7, %v743_v6  ;;  %v634_v14 = vadd.f32 %v633_v9, %v1866_v18  ;;  %v747_v19 = vadd.f32 %v746_v11, %v1872_v20 }
 0x13a   :  { %v635_v13 = vpop.f32.mrf.mxu0  ;;  %v748_v17 = vpop.f32.mrf.mxu1  ;;  %v1947_v3 = vrot.slane %v1861_v15, %v159_v52  ;;  %v1952_v6 = vrot.slane %v1861_v15, %v163_v56 }
 0x13b   :  { %1421 = vst [vmem:[#allocation8 + $0x140] sm:$0xff] %v1639_v10  ;;  %v636_v16 = vadd.f32 %v635_v13, %v1869_v0  ;;  %1422 = vst [vmem:[#allocation8 + $0x148] sm:$0xff] %v1640_v8  ;;  %v749_v22 = vadd.f32 %v748_v17, %v1875_v21 }
 0x13c   :  { %v639_v23 = vpop.f32.mrf.mxu0  ;;  %v752_v25 = vpop.f32.mrf.mxu1 }
 0x13d   :  { %v1643_v24 = vpack.c.bf16 %v636_v16, %v634_v14  ;;  %v1644_v26 = vpack.c.bf16 %v749_v22, %v747_v19  ;;  %v640_v28 = vadd.f32 %v639_v23, %v1866_v18  ;;  %v753_v31 = vadd.f32 %v752_v25, %v1872_v20 }
 0x13e   :  { %v641_v27 = vpop.f32.mrf.mxu0  ;;  %v754_v30 = vpop.f32.mrf.mxu1 }
 0x13f   :  { %1425 = vst [vmem:[#allocation8 + $0x160] sm:$0xff] %v1643_v24  ;;  %v642_v29 = vadd.f32 %v641_v27, %v1869_v0  ;;  %1426 = vst [vmem:[#allocation8 + $0x168] sm:$0xff] %v1644_v26  ;;  %v755_v32 = vadd.f32 %v754_v30, %v1875_v21 }
 0x140   :  { %v643_v33 = vpop.f32.mrf.mxu0  ;;  %v756_v35 = vpop.f32.mrf.mxu1 }
 0x141   :  { %v1647_v34 = vpack.c.bf16 %v642_v29, %v640_v28  ;;  %v1648_v36 = vpack.c.bf16 %v755_v32, %v753_v31  ;;  %v644_v38 = vadd.f32 %v643_v33, %v1866_v18  ;;  %v757_v41 = vadd.f32 %v756_v35, %v1872_v20 }
 0x142   :  { %v645_v37 = vpop.f32.mrf.mxu0  ;;  %v758_v40 = vpop.f32.mrf.mxu1 }
 0x143   :  { %1429 = vst [vmem:[#allocation8 + $0x180] sm:$0xff] %v1647_v34  ;;  %v646_v39 = vadd.f32 %v645_v37, %v1869_v0  ;;  %1430 = vst [vmem:[#allocation8 + $0x188] sm:$0xff] %v1648_v36  ;;  %v759_v42 = vadd.f32 %v758_v40, %v1875_v21 }
 0x144   :  { %v649_v43 = vpop.f32.mrf.mxu0  ;;  %v762_v45 = vpop.f32.mrf.mxu1 }
 0x145   :  { %v1651_v44 = vpack.c.bf16 %v646_v39, %v644_v38  ;;  %v1652_v46 = vpack.c.bf16 %v759_v42, %v757_v41  ;;  %v650_v48 = vadd.f32 %v649_v43, %v1866_v18  ;;  %v763_v53 = vadd.f32 %v762_v45, %v1872_v20 }
 0x146   :  { %v651_v47 = vpop.f32.mrf.mxu0  ;;  %v764_v50 = vpop.f32.mrf.mxu1 }
 0x147   :  { %1433 = vst [vmem:[#allocation8 + $0x1a0] sm:$0xff] %v1651_v44  ;;  %v652_v49 = vadd.f32 %v651_v47, %v1869_v0  ;;  %1434 = vst [vmem:[#allocation8 + $0x1a8] sm:$0xff] %v1652_v46  ;;  %v765_v54 = vadd.f32 %v764_v50, %v1875_v21 }
 0x148   :  { %v653_v55 = vpop.f32.mrf.mxu0  ;;  %v766_v59 = vpop.f32.mrf.mxu1 }
 0x149   :  { %v1655_v58 = vpack.c.bf16 %v652_v49, %v650_v48  ;;  %v1656_v60 = vpack.c.bf16 %v765_v54, %v763_v53  ;;  %v654_v62 = vadd.f32 %v653_v55, %v1866_v18  ;;  %v767_v4 = vadd.f32 %v766_v59, %v1872_v20 }
 0x14a   :  { %v655_v61 = vpop.f32.mrf.mxu0  ;;  %v768_v1 = vpop.f32.mrf.mxu1  ;;  %v1955_v18 = vrot.slane %v1861_v15, %v167_v57 }
 0x14b   :  { %1437 = vst [vmem:[#allocation8 + $0x1c0] sm:$0xff] %v1655_v58  ;;  %v656_v63 = vadd.f32 %v655_v61, %v1869_v0  ;;  %1438 = vst [vmem:[#allocation8 + $0x1c8] sm:$0xff] %v1656_v60  ;;  %v769_v12 = vadd.f32 %v768_v1, %v1875_v21 }
 0x14c   :  { %v805_v5 = vpop.f32.mrf.mxu0  ;;  %v918_v7 = vpop.f32.mrf.mxu1 }
 0x14d   :  { %v1659_v0 = vpack.c.bf16 %v656_v63, %v654_v62  ;;  %v1660_v9 = vpack.c.bf16 %v769_v12, %v767_v4  ;;  %v806_v11 = vadd.f32 %v805_v5, %v1944_v2  ;;  %v919_v20 = vadd.f32 %v918_v7, %v1952_v6 }
 0x14e   :  { %v807_v10 = vpop.f32.mrf.mxu0  ;;  %v920_v13 = vpop.f32.mrf.mxu1 }
 0x14f   :  { %1441 = vst [vmem:[#allocation8 + $0x1e0] sm:$0xff] %v1659_v0  ;;  %v808_v8 = vadd.f32 %v807_v10, %v1947_v3  ;;  %1442 = vst [vmem:[#allocation8 + $0x1e8] sm:$0xff] %v1660_v9  ;;  %v921_v21 = vadd.f32 %v920_v13, %v1955_v18 }
 0x150   :  { %v809_v14 = vpop.f32.mrf.mxu0  ;;  %v922_v17 = vpop.f32.mrf.mxu1 }
 0x151   :  { %v1601_v16 = vpack.c.bf16 %v808_v8, %v806_v11  ;;  %v1602_v15 = vpack.c.bf16 %v921_v21, %v919_v20  ;;  %v810_v22 = vadd.f32 %v809_v14, %v1944_v2  ;;  %v923_v25 = vadd.f32 %v922_v17, %v1952_v6 }
 0x152   :  { %v811_v19 = vpop.f32.mrf.mxu0  ;;  %v924_v24 = vpop.f32.mrf.mxu1 }
 0x153   :  { %1383 = vst [vmem:[#allocation8 + $0x10] sm:$0xff] %v1601_v16  ;;  %v812_v23 = vadd.f32 %v811_v19, %v1947_v3  ;;  %1384 = vst [vmem:[#allocation8 + $0x18] sm:$0xff] %v1602_v15  ;;  %v925_v26 = vadd.f32 %v924_v24, %v1955_v18 }
 0x154   :  { %v815_v27 = vpop.f32.mrf.mxu0  ;;  %v928_v29 = vpop.f32.mrf.mxu1 }
 0x155   :  { %v1605_v28 = vpack.c.bf16 %v812_v23, %v810_v22  ;;  %v1606_v30 = vpack.c.bf16 %v925_v26, %v923_v25  ;;  %v816_v32 = vadd.f32 %v815_v27, %v1944_v2  ;;  %v929_v35 = vadd.f32 %v928_v29, %v1952_v6 }
 0x156   :  { %v817_v31 = vpop.f32.mrf.mxu0  ;;  %v930_v34 = vpop.f32.mrf.mxu1 }
 0x157   :  { %1387 = vst [vmem:[#allocation8 + $0x30] sm:$0xff] %v1605_v28  ;;  %v818_v33 = vadd.f32 %v817_v31, %v1947_v3  ;;  %1388 = vst [vmem:[#allocation8 + $0x38] sm:$0xff] %v1606_v30  ;;  %v931_v36 = vadd.f32 %v930_v34, %v1955_v18 }
 0x158   :  { %v819_v37 = vpop.f32.mrf.mxu0  ;;  %v932_v39 = vpop.f32.mrf.mxu1 }
 0x159   :  { %v1609_v38 = vpack.c.bf16 %v818_v33, %v816_v32  ;;  %v1610_v40 = vpack.c.bf16 %v931_v36, %v929_v35  ;;  %v820_v42 = vadd.f32 %v819_v37, %v1944_v2  ;;  %v933_v45 = vadd.f32 %v932_v39, %v1952_v6 }
 0x15a   :  { %v821_v41 = vpop.f32.mrf.mxu0  ;;  %v934_v44 = vpop.f32.mrf.mxu1 }
 0x15b   :  { %1391 = vst [vmem:[#allocation8 + $0x50] sm:$0xff] %v1609_v38  ;;  %v822_v43 = vadd.f32 %v821_v41, %v1947_v3  ;;  %1392 = vst [vmem:[#allocation8 + $0x58] sm:$0xff] %v1610_v40  ;;  %v935_v46 = vadd.f32 %v934_v44, %v1955_v18 }
 0x15c   :  { %v825_v47 = vpop.f32.mrf.mxu0  ;;  %v938_v49 = vpop.f32.mrf.mxu1 }
 0x15d   :  { %v1613_v48 = vpack.c.bf16 %v822_v43, %v820_v42  ;;  %v1614_v50 = vpack.c.bf16 %v935_v46, %v933_v45  ;;  %v826_v52 = vadd.f32 %v825_v47, %v1944_v2  ;;  %v939_v55 = vadd.f32 %v938_v49, %v1952_v6 }
 0x15e   :  { %v827_v51 = vpop.f32.mrf.mxu0  ;;  %v940_v54 = vpop.f32.mrf.mxu1 }
 0x15f   :  { %1395 = vst [vmem:[#allocation8 + $0x70] sm:$0xff] %v1613_v48  ;;  %v828_v53 = vadd.f32 %v827_v51, %v1947_v3  ;;  %1396 = vst [vmem:[#allocation8 + $0x78] sm:$0xff] %v1614_v50  ;;  %v941_v56 = vadd.f32 %v940_v54, %v1955_v18 }
 0x160   :  { %v829_v57 = vpop.f32.mrf.mxu0  ;;  %v942_v59 = vpop.f32.mrf.mxu1 }
 0x161   :  { %v1617_v58 = vpack.c.bf16 %v828_v53, %v826_v52  ;;  %v1618_v60 = vpack.c.bf16 %v941_v56, %v939_v55  ;;  %v830_v62 = vadd.f32 %v829_v57, %v1944_v2  ;;  %v943_v4 = vadd.f32 %v942_v59, %v1952_v6 }
 0x162   :  { %v831_v61 = vpop.f32.mrf.mxu0  ;;  %v944_v1 = vpop.f32.mrf.mxu1 }
 0x163   :  { %1399 = vst [vmem:[#allocation8 + $0x90] sm:$0xff] %v1617_v58  ;;  %v832_v63 = vadd.f32 %v831_v61, %v1947_v3  ;;  %1400 = vst [vmem:[#allocation8 + $0x98] sm:$0xff] %v1618_v60  ;;  %v945_v12 = vadd.f32 %v944_v1, %v1955_v18 }
 0x164   :  { %v835_v5 = vpop.f32.mrf.mxu0  ;;  %v948_v7 = vpop.f32.mrf.mxu1 }
 0x165   :  { %v1621_v0 = vpack.c.bf16 %v832_v63, %v830_v62  ;;  %v1622_v9 = vpack.c.bf16 %v945_v12, %v943_v4  ;;  %v836_v11 = vadd.f32 %v835_v5, %v1944_v2  ;;  %v949_v20 = vadd.f32 %v948_v7, %v1952_v6 }
 0x166   :  { %v837_v10 = vpop.f32.mrf.mxu0  ;;  %v950_v13 = vpop.f32.mrf.mxu1 }
 0x167   :  { %1403 = vst [vmem:[#allocation8 + $0xb0] sm:$0xff] %v1621_v0  ;;  %v838_v8 = vadd.f32 %v837_v10, %v1947_v3  ;;  %1404 = vst [vmem:[#allocation8 + $0xb8] sm:$0xff] %v1622_v9  ;;  %v951_v21 = vadd.f32 %v950_v13, %v1955_v18 }
 0x168   :  { %v839_v14 = vpop.f32.mrf.mxu0  ;;  %v952_v17 = vpop.f32.mrf.mxu1 }
 0x169   :  { %v1625_v16 = vpack.c.bf16 %v838_v8, %v836_v11  ;;  %v1626_v15 = vpack.c.bf16 %v951_v21, %v949_v20  ;;  %v840_v22 = vadd.f32 %v839_v14, %v1944_v2  ;;  %v953_v25 = vadd.f32 %v952_v17, %v1952_v6 }
 0x16a   :  { %v841_v19 = vpop.f32.mrf.mxu0  ;;  %v954_v24 = vpop.f32.mrf.mxu1 }
 0x16b   :  { %1407 = vst [vmem:[#allocation8 + $0xd0] sm:$0xff] %v1625_v16  ;;  %v842_v23 = vadd.f32 %v841_v19, %v1947_v3  ;;  %1408 = vst [vmem:[#allocation8 + $0xd8] sm:$0xff] %v1626_v15  ;;  %v955_v26 = vadd.f32 %v954_v24, %v1955_v18 }
 0x16c   :  { %v845_v27 = vpop.f32.mrf.mxu0  ;;  %v958_v29 = vpop.f32.mrf.mxu1 }
 0x16d   :  { %v1629_v28 = vpack.c.bf16 %v842_v23, %v840_v22  ;;  %v1630_v30 = vpack.c.bf16 %v955_v26, %v953_v25  ;;  %v846_v32 = vadd.f32 %v845_v27, %v1944_v2  ;;  %v959_v35 = vadd.f32 %v958_v29, %v1952_v6 }
 0x16e   :  { %v847_v31 = vpop.f32.mrf.mxu0  ;;  %v960_v34 = vpop.f32.mrf.mxu1 }
 0x16f   :  { %1411 = vst [vmem:[#allocation8 + $0xf0] sm:$0xff] %v1629_v28  ;;  %v848_v33 = vadd.f32 %v847_v31, %v1947_v3  ;;  %1412 = vst [vmem:[#allocation8 + $0xf8] sm:$0xff] %v1630_v30  ;;  %v961_v36 = vadd.f32 %v960_v34, %v1955_v18 }
 0x170   :  { %v849_v37 = vpop.f32.mrf.mxu0  ;;  %v962_v39 = vpop.f32.mrf.mxu1 }
 0x171   :  { %v1633_v38 = vpack.c.bf16 %v848_v33, %v846_v32  ;;  %v1634_v40 = vpack.c.bf16 %v961_v36, %v959_v35  ;;  %v850_v42 = vadd.f32 %v849_v37, %v1944_v2  ;;  %v963_v45 = vadd.f32 %v962_v39, %v1952_v6 }
 0x172   :  { %v851_v41 = vpop.f32.mrf.mxu0  ;;  %v964_v44 = vpop.f32.mrf.mxu1 }
 0x173   :  { %1415 = vst [vmem:[#allocation8 + $0x110] sm:$0xff] %v1633_v38  ;;  %v852_v43 = vadd.f32 %v851_v41, %v1947_v3  ;;  %1416 = vst [vmem:[#allocation8 + $0x118] sm:$0xff] %v1634_v40  ;;  %v965_v46 = vadd.f32 %v964_v44, %v1955_v18 }
 0x174   :  { %v855_v47 = vpop.f32.mrf.mxu0  ;;  %v968_v49 = vpop.f32.mrf.mxu1 }
 0x175   :  { %v1637_v48 = vpack.c.bf16 %v852_v43, %v850_v42  ;;  %v1638_v50 = vpack.c.bf16 %v965_v46, %v963_v45  ;;  %v856_v52 = vadd.f32 %v855_v47, %v1944_v2  ;;  %v969_v55 = vadd.f32 %v968_v49, %v1952_v6 }
 0x176   :  { %v857_v51 = vpop.f32.mrf.mxu0  ;;  %v970_v54 = vpop.f32.mrf.mxu1 }
 0x177   :  { %1419 = vst [vmem:[#allocation8 + $0x130] sm:$0xff] %v1637_v48  ;;  %v858_v53 = vadd.f32 %v857_v51, %v1947_v3  ;;  %1420 = vst [vmem:[#allocation8 + $0x138] sm:$0xff] %v1638_v50  ;;  %v971_v56 = vadd.f32 %v970_v54, %v1955_v18 }
 0x178   :  { %v859_v57 = vpop.f32.mrf.mxu0  ;;  %v972_v59 = vpop.f32.mrf.mxu1 }
 0x179   :  { %v1641_v58 = vpack.c.bf16 %v858_v53, %v856_v52  ;;  %v1642_v60 = vpack.c.bf16 %v971_v56, %v969_v55  ;;  %v860_v62 = vadd.f32 %v859_v57, %v1944_v2  ;;  %v973_v4 = vadd.f32 %v972_v59, %v1952_v6 }
 0x17a   :  { %v861_v61 = vpop.f32.mrf.mxu0  ;;  %v974_v1 = vpop.f32.mrf.mxu1 }
 0x17b   :  { %1423 = vst [vmem:[#allocation8 + $0x150] sm:$0xff] %v1641_v58  ;;  %v862_v63 = vadd.f32 %v861_v61, %v1947_v3  ;;  %1424 = vst [vmem:[#allocation8 + $0x158] sm:$0xff] %v1642_v60  ;;  %v975_v12 = vadd.f32 %v974_v1, %v1955_v18 }
 0x17c   :  { %v865_v5 = vpop.f32.mrf.mxu0  ;;  %v978_v7 = vpop.f32.mrf.mxu1 }
 0x17d   :  { %v1645_v0 = vpack.c.bf16 %v862_v63, %v860_v62  ;;  %v1646_v9 = vpack.c.bf16 %v975_v12, %v973_v4  ;;  %v866_v11 = vadd.f32 %v865_v5, %v1944_v2  ;;  %v979_v20 = vadd.f32 %v978_v7, %v1952_v6 }
 0x17e   :  { %v867_v10 = vpop.f32.mrf.mxu0  ;;  %v980_v13 = vpop.f32.mrf.mxu1 }
 0x17f   :  { %1427 = vst [vmem:[#allocation8 + $0x170] sm:$0xff] %v1645_v0  ;;  %v868_v8 = vadd.f32 %v867_v10, %v1947_v3  ;;  %1428 = vst [vmem:[#allocation8 + $0x178] sm:$0xff] %v1646_v9  ;;  %v981_v21 = vadd.f32 %v980_v13, %v1955_v18 }
 0x180   :  { %v869_v14 = vpop.f32.mrf.mxu0  ;;  %v982_v17 = vpop.f32.mrf.mxu1 }
 0x181   :  { %v1649_v16 = vpack.c.bf16 %v868_v8, %v866_v11  ;;  %v1650_v15 = vpack.c.bf16 %v981_v21, %v979_v20  ;;  %v870_v22 = vadd.f32 %v869_v14, %v1944_v2  ;;  %v983_v25 = vadd.f32 %v982_v17, %v1952_v6 }
 0x182   :  { %v871_v19 = vpop.f32.mrf.mxu0  ;;  %v984_v24 = vpop.f32.mrf.mxu1 }
 0x183   :  { %1431 = vst [vmem:[#allocation8 + $0x190] sm:$0xff] %v1649_v16  ;;  %v872_v23 = vadd.f32 %v871_v19, %v1947_v3  ;;  %1432 = vst [vmem:[#allocation8 + $0x198] sm:$0xff] %v1650_v15  ;;  %v985_v26 = vadd.f32 %v984_v24, %v1955_v18 }
 0x184   :  { %v875_v27 = vpop.f32.mrf.mxu0  ;;  %v988_v29 = vpop.f32.mrf.mxu1 }
 0x185   :  { %v1653_v28 = vpack.c.bf16 %v872_v23, %v870_v22  ;;  %v1654_v30 = vpack.c.bf16 %v985_v26, %v983_v25  ;;  %v876_v32 = vadd.f32 %v875_v27, %v1944_v2  ;;  %v989_v35 = vadd.f32 %v988_v29, %v1952_v6 }
 0x186   :  { %v877_v31 = vpop.f32.mrf.mxu0  ;;  %v990_v34 = vpop.f32.mrf.mxu1 }
 0x187   :  { %1435 = vst [vmem:[#allocation8 + $0x1b0] sm:$0xff] %v1653_v28  ;;  %v878_v33 = vadd.f32 %v877_v31, %v1947_v3  ;;  %1436 = vst [vmem:[#allocation8 + $0x1b8] sm:$0xff] %v1654_v30  ;;  %v991_v36 = vadd.f32 %v990_v34, %v1955_v18 }
 0x188   :  { %v879_v37 = vpop.f32.mrf.mxu0  ;;  %v992_v39 = vpop.f32.mrf.mxu1 }
 0x189   :  { %v1657_v38 = vpack.c.bf16 %v878_v33, %v876_v32  ;;  %v1658_v40 = vpack.c.bf16 %v991_v36, %v989_v35  ;;  %v880_v42 = vadd.f32 %v879_v37, %v1944_v2  ;;  %v993_v45 = vadd.f32 %v992_v39, %v1952_v6 }
 0x18a   :  { %v881_v41 = vpop.f32.mrf.mxu0  ;;  %v994_v44 = vpop.f32.mrf.mxu1 }
 0x18b   :  { %1439 = vst [vmem:[#allocation8 + $0x1d0] sm:$0xff] %v1657_v38  ;;  %v882_v43 = vadd.f32 %v881_v41, %v1947_v3  ;;  %1440 = vst [vmem:[#allocation8 + $0x1d8] sm:$0xff] %v1658_v40  ;;  %v995_v46 = vadd.f32 %v994_v44, %v1955_v18 }
 0x18d   :  { %v1661_v47 = vpack.c.bf16 %v882_v43, %v880_v42  ;;  %v1662_v48 = vpack.c.bf16 %v995_v46, %v993_v45 }
 0x18f   :  { %1443 = vst [vmem:[#allocation8 + $0x1f0] sm:$0xff] %v1661_v47  ;;  %1444 = vst [vmem:[#allocation8 + $0x1f8] sm:$0xff] %v1662_v48 }
 0x190   :  { %1751 = shalt.err (!%p1748_p5)
}
 0x191   :  { %1456 = dma.vmem_to_hbm [thread:$0]  %s1451_s2, 8192, %s2030_s3, [#allocation4], %s1767_s15, %s1767_s15, %s1768_s16  }
 0x192   :  { %1764 = dma.done.wait [#allocation4], 8192  }
 0x193   :  { %1765 = vsyncadd [#allocation4], 4294959104 }
 0x194   :  { %1460 = vsyncpa [#allocation3], 1 }
 0x195   :  { %1461 = vsyncpa [#allocation6], 1 }
 0x196   :  { %1462 = vsyncpa [#allocation4], 1 }

</bundles_post_ra>
